<compile_context>
chip_gen: v7x
topology: tpu7x:2x2x1
jax: 0.10.0
libtpu: 0.0.40
codegen_flags: <defaults>
</compile_context>

<pallas_src>
import jax
import jax.numpy as jnp
from jax import lax
from jax.experimental import pallas as pl
from jax.experimental.pallas import tpu as pltpu


def _round_down(x: int, m: int) -> int:
    return (x // m) * m


def _linear_kernel(x_ref, w_ref, o_ref):
    # x_ref: (TB, K) in VMEM (batch on sublanes, features on lanes)
    # w_ref: (N, K)  in VMEM (PyTorch layout, lane-dense on K — no transpose)
    # o_ref: (TB, N) in VMEM
    # y = x @ W.T expressed as a contraction over axis 1 of both operands, so
    # W is never relaid out; the MXU accumulates in f32 regardless of operand
    # dtype (bf16 operands are MXU-native on v5e/v6e/v7x).
    o_ref[...] = lax.dot_general(
        x_ref[...],
        w_ref[...],
        dimension_numbers=(((1,), (1,)), ((), ())),
        preferred_element_type=jnp.float32,
    ).astype(o_ref.dtype)


def prepare_weight(weight, compute_dtype=None):
    """One-time (init-time) weight preparation.

    The weight is static, so any cast to the matmul operand dtype is done here
    exactly once instead of on every forward call.  No padding is needed: the
    kernel contracts against the native (output_size, input_size) layout.
    """
    if compute_dtype is not None:
        weight = weight.astype(compute_dtype)
    return weight


def _pick_batch_tile(K, N, itemsize, vmem_budget_bytes=12 * 1024 * 1024):
    # VMEM budget per grid step:
    #   2 * TB * K * elem   (double-buffered x tiles)
    # + N * K * elem        (resident weight)
    # + 2 * TB * N * 4      (double-buffered f32 output tiles)
    # 12 MiB fits v5e's 16 MiB default scoped VMEM; v6e (128 MiB) and v7x
    # (64 MiB) have more headroom, so this is the conservative common choice.
    denom = 2 * K * itemsize + 2 * N * 4
    tb = (vmem_budget_bytes - N * K * itemsize) // max(denom, 1)
    tb = _round_down(tb, 16)  # 16 sublanes: bf16 vreg packing / MXU row fill
    return int(max(16, min(tb, 1024)))


def single_layer_perceptron(x, weight, compute_dtype=None, batch_tile=None):
    """y = x @ weight.T (bias-free nn.Linear), weight in PyTorch (N, K) layout.

    `weight` should already have gone through prepare_weight() so that no
    per-call cast/pad ops are emitted for the static parameter.
    """
    B, K = x.shape
    N, Kw = weight.shape
    assert K == Kw, (K, Kw)

    if compute_dtype is not None and x.dtype != compute_dtype:
        x = x.astype(compute_dtype)
    if compute_dtype is not None and weight.dtype != compute_dtype:
        weight = weight.astype(compute_dtype)  # fallback if not pre-prepared

    itemsize = jnp.dtype(x.dtype).itemsize
    cost = pl.CostEstimate(
        flops=2 * B * K * N,
        transcendentals=0,
        bytes_accessed=(B * K + N * K) * itemsize + B * N * 4,
    )

    if batch_tile is None:
        batch_tile = _pick_batch_tile(K, N, itemsize)

    if B <= batch_tile:
        # Small batch: one grid-less call, full-array VMEM blocks, no padding,
        # no output slicing.  Full-array blocks are exempt from the (8,128)
        # divisibility rule; Mosaic's masked loads/stores cost nothing here.
        return pl.pallas_call(
            _linear_kernel,
            out_shape=jax.ShapeDtypeStruct((B, N), jnp.float32),
            in_specs=[
                pl.BlockSpec(memory_space=pltpu.MemorySpace.VMEM),
                pl.BlockSpec(memory_space=pltpu.MemorySpace.VMEM),
            ],
            out_specs=pl.BlockSpec(memory_space=pltpu.MemorySpace.VMEM),
            cost_estimate=cost,
        )(x, weight)

    # Large batch: tile the batch axis so the HBM->VMEM DMA of x overlaps MXU
    # compute (Pallas double-buffering) while W stays resident in VMEM.  The
    # batch axis is "parallel" so v7x's two TensorCores split the rows (no-op
    # on single-TC v5e/v6e).  A partial last tile is handled by Pallas output
    # masking (out-of-range rows are never stored).
    grid = (pl.cdiv(B, batch_tile),)
    return pl.pallas_call(
        _linear_kernel,
        out_shape=jax.ShapeDtypeStruct((B, N), jnp.float32),
        grid=grid,
        in_specs=[
            pl.BlockSpec((batch_tile, K), lambda i: (i, 0)),
            pl.BlockSpec((N, K), lambda i: (0, 0)),  # resident weight
        ],
        out_specs=pl.BlockSpec((batch_tile, N), lambda i: (i, 0)),
        compiler_params=pltpu.CompilerParams(
            dimension_semantics=("parallel",),
        ),
        cost_estimate=cost,
    )(x, weight)


if __name__ == "__main__":
    # Shapes consistent with knock71: 300-dim word vectors -> 4 classes.
    input_size, output_size = 300, 4

    key = jax.random.PRNGKey(0)
    kx, kw, kxl = jax.random.split(key, 3)

    # nn.init.normal_(self.fc.weight, 0.0, 1.0) -> standard normal weights.
    weight = jax.random.normal(kw, (output_size, input_size), dtype=jnp.float32)

    # Init-time weight preparation (done once, outside the per-call path).
    w_f32 = prepare_weight(weight)                   # no-op for f32
    w_bf16 = prepare_weight(weight, jnp.bfloat16)    # one-time cast

    # --- small batch (knock71 shape), f32 path -----------------------------
    B = 4
    x = jax.random.normal(kx, (B, input_size), dtype=jnp.float32)
    y = single_layer_perceptron(x, w_f32)
    jax.block_until_ready(y)
    y_ref = x @ weight.T
    assert y.shape == (B, output_size)
    assert jnp.allclose(y, y_ref, atol=1e-4, rtol=1e-4)

    # --- larger batch: exercises the batch-grid (parallel) path, f32 -------
    Bl = 1024
    xl = jax.random.normal(kxl, (Bl, input_size), dtype=jnp.float32)
    yl = single_layer_perceptron(xl, w_f32, batch_tile=256)  # grid = (4,)
    jax.block_until_ready(yl)
    yl_ref = xl @ weight.T
    assert yl.shape == (Bl, output_size)
    assert jnp.allclose(yl, yl_ref, atol=1e-3, rtol=1e-3)

    # --- bf16 operand path (MXU-native on all generations), f32 accum ------
    y_bf16 = single_layer_perceptron(x, w_bf16, compute_dtype=jnp.bfloat16)
    jax.block_until_ready(y_bf16)
    ref_bf16 = (
        x.astype(jnp.bfloat16).astype(jnp.float32)
        @ weight.astype(jnp.bfloat16).astype(jnp.float32).T
    )
    assert y_bf16.shape == (B, output_size)
    assert jnp.allclose(y_bf16, ref_bf16, atol=1e-2, rtol=1e-2)

    print("KERNEL_OK")
</pallas_src>

<mosaic_0001>
module attributes {stable_mosaic.version = 11 : i64} {
  func.func @_linear_kernel(%arg0: memref<4x300xf32, #tpu.memory_space<vmem>>, %arg1: memref<4x300xf32, #tpu.memory_space<vmem>>, %arg2: memref<4x4xf32, #tpu.memory_space<vmem>>) attributes {dimension_semantics = [], scalar_prefetch = 0 : i64, scratch_operands = 0 : i64, tpu.core_type = #tpu.core_type<tc>} {
    %c0 = arith.constant 0 : index
    %c0_0 = arith.constant 0 : index
    %0 = vector.load %arg0[%c0, %c0_0] : memref<4x300xf32, #tpu.memory_space<vmem>>, vector<4x300xf32>
    %c0_1 = arith.constant 0 : index
    %c0_2 = arith.constant 0 : index
    %1 = vector.load %arg1[%c0_1, %c0_2] : memref<4x300xf32, #tpu.memory_space<vmem>>, vector<4x300xf32>
    %cst = arith.constant dense<0.000000e+00> : vector<4x4xf32>
    %2 = tpu.matmul %0, %1, %cst {dimension_numbers = #tpu.dot_dimension_numbers<[1], [1], [0], [0], [0, 0, 1, 0], [], []>} : vector<4x300xf32>, vector<4x300xf32>, vector<4x4xf32> -> vector<4x4xf32>
    %c0_3 = arith.constant 0 : index
    %c0_4 = arith.constant 0 : index
    %3 = vector.load %arg2[%c0_3, %c0_4] : memref<4x4xf32, #tpu.memory_space<vmem>>, vector<4x4xf32>
    tpu.vector_store %arg2[%c0_3, %c0_4], %2 {strides = array<i32>} : memref<4x4xf32, #tpu.memory_space<vmem>>, vector<4x4xf32>,
    return
  }
}

</mosaic_0001>

<bundles_post_ra>
// kernel: tpu_custom_call.1
= control target key start
LH: loop header
LB: loop body
LE: loop exit
PB: predicated region body
PF: predicated region fallthrough
CT: control target
= control target key end

     0   :  { %7 = vsyncpa [#allocation3], 0  ;;  %s356_s0 = inlined_call_operand.hbm [shape: f32[4,300], index: 0, kind: input, shape index: {}]   ;;  %s357_s1 = inlined_call_operand.hbm [shape: f32[4,300], index: 1, kind: input, shape index: {}]   ;;  %s358_s2 = inlined_call_operand.hbm [shape: f32[4,4], index: 2, kind: output, shape index: {}]  }
   0x1   :  { %8 = vsyncpa [#allocation6], 0 }
   0x2   :  { %9 = vsyncpa [#allocation4], 0  ;;  %s300_s9 = smov [#allocation2]   ;;  %s301_s11 = smov [#allocation5]  }
   0x3   :  { %s16_s10 = sshll.u32 %s300_s9, 4  ;;  %s26_s12 = sshll.u32 %s301_s11, 4  ;;  %s17_s10 = int_to_ptr.vmem [resolvable:$true] %s16_s10  ;;  %s27_s12 = int_to_ptr.vmem [resolvable:$true] %s26_s12 }
   0x4   :  { %s228_s15 = scalar_lea.hbm %s356_s0, 192 }
   0x5   :  { %p229_p0 = scmp.ne.s32.totalorder %s356_s0, %s228_s15  ;;  %p232_p1 = scmp.lt.u32.totalorder %s228_s15, %s356_s0 }
   0x7   :  { %p234_p2 = pnand %p232_p1, %p229_p0 }
   0x9   :  { %237 = shalt.err (!%p234_p2)
}
   0xa   :  { %s238_s20 = scalar_lea.vmem %s17_s10, 192  ;;  %p243_p4 = scmp.lt.s32.totalorder %s17_s10, %s17_s10 }
   0xb   :  { %p239_p3 = scmp.ne.s32.totalorder %s17_s10, %s238_s20  ;;  %p244_p5 = scmp.lt.s32.totalorder %s238_s20, %s238_s20 }
   0xd   :  { %p245_p6 = por %p244_p5, %p243_p4 }
   0xf   :  { %p246_p7 = pnand %p245_p6, %p239_p3 }
  0x11   :  { %249 = shalt.err (!%p246_p7)
}
  0x12   :  { %19 = dma.hbm_to_vmem [thread:$0]  %s356_s0, 192, %s17_s10, [#allocation3]  }
  0x13   :  { %s250_s25 = scalar_lea.hbm %s357_s1, 192 }
  0x14   :  { %p251_p8 = scmp.ne.s32.totalorder %s357_s1, %s250_s25  ;;  %p254_p9 = scmp.lt.u32.totalorder %s250_s25, %s357_s1 }
  0x16   :  { %p256_p10 = pnand %p254_p9, %p251_p8 }
  0x18   :  { %259 = shalt.err (!%p256_p10)
}
  0x19   :  { %s260_s30 = scalar_lea.vmem %s27_s12, 192  ;;  %p265_p12 = scmp.lt.s32.totalorder %s27_s12, %s27_s12 }
  0x1a   :  { %p261_p11 = scmp.ne.s32.totalorder %s27_s12, %s260_s30  ;;  %p266_p13 = scmp.lt.s32.totalorder %s260_s30, %s260_s30 }
  0x1c   :  { %p267_p0 = por %p266_p13, %p265_p12 }
  0x1e   :  { %p268_p1 = pnand %p267_p0, %p261_p11 }
  0x20   :  { %271 = shalt.err (!%p268_p1)
}
  0x21   :  { %29 = dma.hbm_to_vmem [thread:$0]  %s357_s1, 192, %s27_s12, [#allocation6]  }
  0x22   :  { %294 = dma.done.wait [#allocation3], 192  }
  0x23   :  { %295 = vsyncadd [#allocation3], 4294967104 }
  0x24   :  { %296 = dma.done.wait [#allocation6], 192  }
  0x25   :  { %297 = vsyncadd [#allocation6], 4294967104  ;;  %v302_v0 = vmov 0.0   ;;  %vm303_vm0 = vmmov 0   ;;  %vm48_vm1 = vcmask 359424   ;;  %v38_v1 = vld [vmem:[#allocation5] sm:$0xff] }
  0x26   :  { %215 = vmatprep.subr.mxu0 %v302_v0  ;;  %217 = vmatprep.mubr.msk.f32.mxu0 %vm303_vm0, %v302_v0  ;;  %v39_v2 = vld [vmem:[#allocation5 + $0x8] sm:$0xf]  ;;  %v36_v3 = vld [vmem:[#allocation2] sm:$0xff]  ;;  %v46_v4 = vcombine.high %v38_v1, %v38_v1  ;;  %v37_v6 = vld [vmem:[#allocation2 + $0x8] sm:$0xf]  ;;  %s304_s1 = smov [#allocation7]  }
  0x27   :  { %216 = vmatpush3.xpose.msk.msra.mxu0 %vm48_vm1, %v39_v2  ;;  %v42_v5 = vcombine.high %v36_v3, %v36_v3  ;;  %s201_s4 = sshll.u32 %s304_s1, 4  ;;  %vm193_vm2 = vcmask 27648   ;;  %s202_s4 = int_to_ptr.vmem [resolvable:$true] %s201_s4 }
  0x28   :  { %53 = vmatprep.subr.mxu1 %v46_v4  ;;  %s272_s5 = scalar_lea.vmem %s202_s4, 64  ;;  %p277_p3 = scmp.lt.s32.totalorder %s202_s4, %s202_s4 }
  0x29   :  { %117 = vmatprep.mubr.f32.mxu1 %v42_v5  ;;  %54 = vmatpush1.xpose.msra.mxu1 %v38_v1  ;;  %p273_p2 = scmp.ne.s32.totalorder %s202_s4, %s272_s5  ;;  %p278_p4 = scmp.lt.s32.totalorder %s272_s5, %s272_s5 }
  0x2a   :  { %218 = vmatmul.mubr.msk.f32.vlgmr.msra.gmra.mrb[0].mxu0 %vm48_vm1, %v37_v6 }
  0x2b   :  { %p279_p5 = por %p278_p4, %p277_p3 }
  0x2c   :  { %118 = vmatmul.mubr.f32.vlgmr.msra.gmra.mrb[0].mxu1 %v36_v3 }
  0x2d   :  { %p280_p6 = pnand %p279_p5, %p273_p2 }
  0xfd   :  { %v189_v7 = vpop.f32.mrb[0].mxu0 }
  0xfe   :  { %v219_v8 = vpop.f32.mrb[1].mxu0 }
  0xff   :  { %v119_v9 = vpop.f32.mrb[0].mxu1 }
 0x100   :  { %v190_v10 = vadd.f32 %v189_v7, %v119_v9  ;;  %v121_v11 = vpop.f32.mrb[1].mxu1 }
 0x102   :  { %194 = vst.msk [vmem:[#allocation7] sm:$0xf] %vm193_vm2, %v190_v10 }
 0x103   :  { %283 = shalt.err (!%p280_p6)
}
 0x104   :  { %s284_s8 = scalar_lea.hbm %s358_s2, 64 }
 0x105   :  { %p285_p7 = scmp.ne.s32.totalorder %s358_s2, %s284_s8  ;;  %p288_p8 = scmp.lt.u32.totalorder %s284_s8, %s358_s2 }
 0x107   :  { %p290_p9 = pnand %p288_p8, %p285_p7 }
 0x109   :  { %293 = shalt.err (!%p290_p9)
}
 0x10a   :  { %204 = dma.vmem_to_hbm [thread:$0]  %s202_s4, 64, %s358_s2, [#allocation4]  }
 0x10b   :  { %298 = dma.done.wait [#allocation4], 64  }
 0x10c   :  { %299 = vsyncadd [#allocation4], 4294967232 }
 0x10d   :  { %208 = vsyncpa [#allocation3], 1 }
 0x10e   :  { %209 = vsyncpa [#allocation6], 1 }
 0x10f   :  { %210 = vsyncpa [#allocation4], 1 }

</bundles_post_ra>
